<compile_context>
chip_gen: v7x
topology: tpu7x:2x2x1
jax: 0.10.0
libtpu: 0.0.40
codegen_flags: <defaults>
</compile_context>

<pallas_src>
import functools

import jax
import jax.numpy as jnp
from jax.experimental import pallas as pl
from jax.experimental.pallas import tpu as pltpu

LANE = 128
_FUSED_VMEM_BUDGET = 12 * 1024 * 1024    # conservative: fits every generation's default
_PASS2_VMEM_BUDGET = 24 * 1024 * 1024    # paired with vmem_limit_bytes below
_PASS2_VMEM_LIMIT = 32 * 1024 * 1024     # == v6e/v7x scoped default, safe on v5e too


def _round_up(x, m):
    return (x + m - 1) // m * m


def _pick_tile(dim_p, pref):
    """Largest multiple of 128 that is <= pref and divides dim_p (dim_p % 128 == 0)."""
    t = max(LANE, min(pref, dim_p))
    t = (t // LANE) * LANE
    while dim_p % t:
        t -= LANE
    return t


# --------------------------------------------------------------------------------
# Fused path (small graphs): one kernel per batch element, no padding, no XW in HBM.
# --------------------------------------------------------------------------------
def _fused_kernel(alpha_ref, adj_ref, x_ref, w_ref, b_ref, o_ref):
    # XW = X @ W (f32 accumulation), out = PReLU(adj @ XW + bias); bf16 MXU operands.
    xw = jnp.dot(x_ref[...].astype(jnp.bfloat16), w_ref[...],
                 preferred_element_type=jnp.float32)
    h = jnp.dot(adj_ref[...].astype(jnp.bfloat16), xw.astype(jnp.bfloat16),
                preferred_element_type=jnp.float32) + b_ref[...]
    alpha = alpha_ref[0]
    o_ref[...] = jnp.where(h > 0.0, h, alpha * h).astype(o_ref.dtype)


def _fused_forward(seq, adj, w_bf16, bias2d, alpha1d):
    B, N, F_in = seq.shape
    F_h = w_bf16.shape[1]
    flops = 2 * B * (N * F_in * F_h + N * N * F_h)
    bytes_accessed = (B * (N * N + N * F_in + N * F_h) * 4
                      + F_in * F_h * 2 + F_h * 4)
    return pl.pallas_call(
        _fused_kernel,
        out_shape=jax.ShapeDtypeStruct((B, N, F_h), jnp.float32),
        grid=(B,),
        in_specs=[
            pl.BlockSpec(memory_space=pltpu.MemorySpace.SMEM),        # alpha (scalar)
            pl.BlockSpec((None, N, N), lambda b: (b, 0, 0)),          # adj   (f32)
            pl.BlockSpec((None, N, F_in), lambda b: (b, 0, 0)),       # seq   (f32)
            pl.BlockSpec((F_in, F_h), lambda b: (0, 0)),              # W     (bf16)
            pl.BlockSpec((1, F_h), lambda b: (0, 0)),                 # bias  (f32)
        ],
        out_specs=pl.BlockSpec((None, N, F_h), lambda b: (b, 0, 0)),
        compiler_params=pltpu.CompilerParams(
            dimension_semantics=("parallel",)),
        cost_estimate=pl.CostEstimate(flops=flops, transcendentals=0,
                                      bytes_accessed=bytes_accessed),
    )(alpha1d, adj, seq, w_bf16, bias2d)


# --------------------------------------------------------------------------------
# Pass 1: feature transform  XW = X @ W   (X read f32, cast in-kernel, bf16 output)
# --------------------------------------------------------------------------------
def _xw_kernel(x_ref, w_ref, o_ref, acc_ref):
    k = pl.program_id(2)

    @pl.when(k == 0)
    def _():
        acc_ref[...] = jnp.zeros_like(acc_ref)

    acc_ref[...] += jnp.dot(x_ref[...].astype(jnp.bfloat16), w_ref[...],
                            preferred_element_type=jnp.float32)

    @pl.when(k == pl.num_programs(2) - 1)
    def _():
        o_ref[...] = acc_ref[...].astype(o_ref.dtype)


def _feature_transform(x2d, w_bf16, *, tm, tn, tk):
    M, K = x2d.shape
    N = w_bf16.shape[1]
    grid = (M // tm, N // tn, K // tk)
    flops = 2 * M * K * N
    bytes_accessed = M * K * 4 + K * N * 2 + M * N * 2
    return pl.pallas_call(
        _xw_kernel,
        out_shape=jax.ShapeDtypeStruct((M, N), jnp.bfloat16),
        grid=grid,
        in_specs=[
            pl.BlockSpec((tm, tk), lambda i, j, k: (i, k)),
            pl.BlockSpec((tk, tn), lambda i, j, k: (k, j)),
        ],
        out_specs=pl.BlockSpec((tm, tn), lambda i, j, k: (i, j)),
        scratch_shapes=[pltpu.VMEM((tm, tn), jnp.float32)],
        compiler_params=pltpu.CompilerParams(
            dimension_semantics=("parallel", "parallel", "arbitrary")),
        cost_estimate=pl.CostEstimate(flops=flops, transcendentals=0,
                                      bytes_accessed=bytes_accessed),
    )(x2d, w_bf16)


# --------------------------------------------------------------------------------
# Pass 2: graph propagation  out = PReLU(adj @ XW + bias)
#   adj read f32 + cast in-kernel; XW VMEM-resident per batch when it fits.
# --------------------------------------------------------------------------------
def _prop_kernel(alpha_ref, adj_ref, xw_ref, b_ref, o_ref, acc_ref, *,
                 tk, xw_resident):
    k = pl.program_id(2)

    @pl.when(k == 0)
    def _():
        acc_ref[...] = jnp.zeros_like(acc_ref)

    adj_tile = adj_ref[...].astype(jnp.bfloat16)           # f32 HBM -> bf16 MXU operand
    if xw_resident:
        start = pl.multiple_of(k * tk, LANE)
        xw_tile = xw_ref[pl.ds(start, tk), :]               # slice k-panel of resident XW
    else:
        xw_tile = xw_ref[...]
    acc_ref[...] += jnp.dot(adj_tile, xw_tile, preferred_element_type=jnp.float32)

    @pl.when(k == pl.num_programs(2) - 1)
    def _():
        # f32 epilogue (bias + PReLU); cast only at the final store.
        h = acc_ref[...] + b_ref[...]
        alpha = alpha_ref[0]
        o_ref[...] = jnp.where(h > 0.0, h, alpha * h).astype(o_ref.dtype)


def _propagate(alpha1d, adj_f32, xw3d, bias2d, *, tn, tk, xw_resident):
    B, Np, _ = adj_f32.shape
    Fh = xw3d.shape[-1]
    grid = (B, Np // tn, Np // tk)
    if xw_resident:
        xw_spec = pl.BlockSpec((None, Np, Fh), lambda b, i, k: (b, 0, 0))
        xw_reads = B * Np * Fh * 2
    else:
        xw_spec = pl.BlockSpec((None, tk, Fh), lambda b, i, k: (b, k, 0))
        xw_reads = B * (Np // tn) * Np * Fh * 2
    flops = 2 * B * Np * Np * Fh
    bytes_accessed = B * Np * Np * 4 + xw_reads + B * Np * Fh * 4 + Fh * 4
    kernel = functools.partial(_prop_kernel, tk=tk, xw_resident=xw_resident)
    return pl.pallas_call(
        kernel,
        out_shape=jax.ShapeDtypeStruct((B, Np, Fh), jnp.float32),
        grid=grid,
        in_specs=[
            pl.BlockSpec(memory_space=pltpu.MemorySpace.SMEM),           # alpha (scalar)
            pl.BlockSpec((None, tn, tk), lambda b, i, k: (b, i, k)),     # adj tile (f32)
            xw_spec,                                                     # XW (bf16)
            pl.BlockSpec((1, Fh), lambda b, i, k: (0, 0)),               # bias
        ],
        out_specs=pl.BlockSpec((None, tn, Fh), lambda b, i, k: (b, i, 0)),
        scratch_shapes=[pltpu.VMEM((tn, Fh), jnp.float32)],
        compiler_params=pltpu.CompilerParams(
            dimension_semantics=("parallel", "parallel", "arbitrary"),
            vmem_limit_bytes=_PASS2_VMEM_LIMIT),
        cost_estimate=pl.CostEstimate(flops=flops, transcendentals=0,
                                      bytes_accessed=bytes_accessed),
    )(alpha1d, adj_f32, xw3d, bias2d)


# --------------------------------------------------------------------------------
# Wrapper
# --------------------------------------------------------------------------------
def _fused_vmem_bytes(B, N, F_in, F_h):
    per_batch = (N * N + N * F_in + N * F_h) * 4        # adj + seq + out (f32)
    shared = F_in * F_h * 2 + F_h * 4                   # W (bf16) + bias
    return 2 * per_batch + 2 * shared                   # double-buffered


@functools.partial(jax.jit, static_argnames=("fused",))
def gcnet_forward(seq, adj, w, bias, alpha, *, fused=None):
    """GCNet forward (dense path, sparse=False).

    seq: (B, N, F_in) f32, adj: (B, N, N) f32, w: (F_in, F_h) f32,
    bias: (F_h,) f32, alpha: scalar f32.  Returns (B, N, F_h) f32.
    """
    B, N, F_in = seq.shape
    F_h = w.shape[1]
    alpha1d = jnp.asarray(alpha, jnp.float32).reshape(1)

    if fused is None:
        fused = _fused_vmem_bytes(B, N, F_in, F_h) <= _FUSED_VMEM_BUDGET

    if fused:
        # Small-graph path: no padding, one launch, XW never touches HBM.
        w_bf16 = w.astype(jnp.bfloat16)
        bias2d = bias.reshape(1, F_h).astype(jnp.float32)
        return _fused_forward(seq.astype(jnp.float32), adj.astype(jnp.float32),
                              w_bf16, bias2d, alpha1d)

    # Large-graph two-pass path: pad node / feature axes to lane (128) multiples so
    # every MXU tile is lane-dense; zero padding is inert for both matmuls.
    Np = _round_up(N, LANE)
    Fi = _round_up(F_in, LANE)
    Fh = _round_up(F_h, LANE)

    seq_p = jnp.pad(seq.astype(jnp.float32), ((0, 0), (0, Np - N), (0, Fi - F_in)))
    adj_p = jnp.pad(adj.astype(jnp.float32), ((0, 0), (0, Np - N), (0, Np - N)))
    w_p = jnp.pad(w, ((0, Fi - F_in), (0, Fh - F_h))).astype(jnp.bfloat16)
    bias_p = jnp.pad(bias, (0, Fh - F_h)).reshape(1, Fh).astype(jnp.float32)

    # Pass 1: one batched (B*Np, Fi) @ (Fi, Fh) matmul (fills the MXU M dimension).
    x2d = seq_p.reshape(B * Np, Fi)
    M = B * Np
    tm = _pick_tile(M, 512)
    tfh = _pick_tile(Fh, 512)
    tfk = _pick_tile(Fi, 1024)
    if (M // tm) * (Fh // tfh) < 2 and tm > LANE:        # keep both v7x cores busy
        tm = _pick_tile(M, tm // 2)
    xw = _feature_transform(x2d, w_p, tm=tm, tn=tfh, tk=tfk)
    xw3d = xw.reshape(B, Np, Fh)

    # Pass 2: tiled adj @ XW with per-batch resident XW (when the budget allows).
    tn = _pick_tile(Np, 512)
    tk = _pick_tile(Np, 512)
    if B * (Np // tn) < 2 and tn > LANE:                 # >= 2 parallel iterations
        tn = _pick_tile(Np, tn // 2)

    def _pass2_bytes(tn_, tk_, resident):
        xw_bytes = 2 * Np * Fh * 2 if resident else 2 * tk_ * Fh * 2
        return (2 * tn_ * tk_ * 4        # adj tiles (f32, double-buffered)
                + xw_bytes               # XW (bf16)
                + 2 * tn_ * Fh * 4       # out tiles (f32)
                + tn_ * Fh * 4           # f32 accumulator
                + 2 * Fh * 4)            # bias

    xw_resident = _pass2_bytes(tn, tk, True) <= _PASS2_VMEM_BUDGET
    while _pass2_bytes(tn, tk, xw_resident) > _PASS2_VMEM_BUDGET and max(tn, tk) > LANE:
        if tk >= tn:
            tk = _pick_tile(Np, max(LANE, tk // 2))
        else:
            tn = _pick_tile(Np, max(LANE, tn // 2))
    # TODO(synk): tile Fh as well for very large n_h (>= ~2048) instead of shrinking tn/tk.

    out = _propagate(alpha1d, adj_p, xw3d, bias_p, tn=tn, tk=tk,
                     xw_resident=xw_resident)
    return out[:, :N, :F_h]


# ----------------------------- references ---------------------------------------
def reference_forward_bf16(seq, adj, w, bias, alpha):
    """Reference with matmul operands in bf16 (matches kernel numerics)."""
    xw = jnp.einsum("bnf,fh->bnh", seq.astype(jnp.bfloat16), w.astype(jnp.bfloat16),
                    preferred_element_type=jnp.float32).astype(jnp.bfloat16)
    h = jnp.einsum("bnm,bmh->bnh", adj.astype(jnp.bfloat16), xw,
                   preferred_element_type=jnp.float32) + bias
    return jnp.where(h > 0, h, alpha * h)


def reference_forward_f32(seq, adj, w, bias, alpha):
    xw = jnp.einsum("bnf,fh->bnh", seq, w)
    h = jnp.einsum("bnm,bmh->bnh", adj, xw) + bias
    return jnp.where(h > 0, h, alpha * h)


def _make_inputs(k_seq, k_adj, k_w, B, N, F_in, F_h):
    seq = jax.random.normal(k_seq, (B, N, F_in), dtype=jnp.float32)
    a = jax.random.uniform(k_adj, (B, N, N), dtype=jnp.float32)
    a = 0.5 * (a + jnp.swapaxes(a, -1, -2)) + jnp.eye(N)[None]
    adj = a / jnp.sum(a, axis=-1, keepdims=True)           # row-normalized, dense
    w = jax.random.normal(k_w, (F_in, F_h), dtype=jnp.float32) * (1.0 / jnp.sqrt(F_in))
    return seq, adj, w


if __name__ == "__main__":
    key = jax.random.PRNGKey(0)
    k_seq, k_adj, k_w, k_seq2, k_adj2, k_w2 = jax.random.split(key, 6)
    alpha = jnp.float32(0.25)    # PReLU default init

    # --- small shapes consistent with GCN(n_in, n_h): exercises the fused path ---
    B, N, F_in, F_h = 2, 16, 32, 32
    seq, adj, w = _make_inputs(k_seq, k_adj, k_w, B, N, F_in, F_h)
    bias = jnp.zeros((F_h,), dtype=jnp.float32)

    out = gcnet_forward(seq, adj, w, bias, alpha)
    jax.block_until_ready(out)
    assert out.shape == (B, N, F_h)
    assert jnp.allclose(out, reference_forward_bf16(seq, adj, w, bias, alpha),
                        atol=1e-2, rtol=1e-2), "fused path: mismatch vs bf16 reference"
    assert jnp.allclose(out, reference_forward_f32(seq, adj, w, bias, alpha),
                        atol=5e-2, rtol=5e-2), "fused path: mismatch vs f32 reference"

    # --- exercise the tiled two-pass path (resident XW, in-kernel adj cast) ---
    B2, N2, F_in2, F_h2 = 2, 256, 128, 128
    seq2, adj2, w2 = _make_inputs(k_seq2, k_adj2, k_w2, B2, N2, F_in2, F_h2)
    bias2 = 0.05 * jnp.sin(jnp.arange(F_h2, dtype=jnp.float32))

    out2 = gcnet_forward(seq2, adj2, w2, bias2, alpha, fused=False)
    jax.block_until_ready(out2)
    assert out2.shape == (B2, N2, F_h2)
    assert jnp.allclose(out2, reference_forward_bf16(seq2, adj2, w2, bias2, alpha),
                        atol=1e-2, rtol=1e-2), "two-pass path: mismatch vs bf16 reference"
    assert jnp.allclose(out2, reference_forward_f32(seq2, adj2, w2, bias2, alpha),
                        atol=5e-2, rtol=5e-2), "two-pass path: mismatch vs f32 reference"

    # TODO(synk): sparse=True path (torch.sparse.mm) not implemented; dense adj only.
    print("KERNEL_OK")
</pallas_src>

<mosaic_0001>
module attributes {stable_mosaic.version = 11 : i64} {
  func.func @_fused_kernel(%arg0: i32, %arg1: memref<1xf32, #tpu.memory_space<smem>>, %arg2: memref<1x16x16xf32, #tpu.memory_space<vmem>>, %arg3: memref<1x16x32xf32, #tpu.memory_space<vmem>>, %arg4: memref<32x32xbf16, #tpu.memory_space<vmem>>, %arg5: memref<1x32xf32, #tpu.memory_space<vmem>>, %arg6: memref<1x16x32xf32, #tpu.memory_space<vmem>>) attributes {dimension_semantics = [#tpu.dimension_semantics<parallel>], iteration_bounds = array<i64: 2>, scalar_prefetch = 0 : i64, scratch_operands = 0 : i64, tpu.core_type = #tpu.core_type<tc>, window_params = [{transform_indices = @transform_0, window_bounds = array<i64: 1>}, {transform_indices = @transform_1, window_bounds = array<i64: 1, 16, 16>}, {transform_indices = @transform_2, window_bounds = array<i64: 1, 16, 32>}, {pipeline_mode = #tpu.pipeline_mode<synchronous>, transform_indices = @transform_3, window_bounds = array<i64: 32, 32>}, {pipeline_mode = #tpu.pipeline_mode<synchronous>, transform_indices = @transform_4, window_bounds = array<i64: 1, 32>}, {transform_indices = @transform_5, window_bounds = array<i64: 1, 16, 32>}]} {
    %c0 = arith.constant 0 : index
    %c0_0 = arith.constant 0 : index
    %c0_1 = arith.constant 0 : index
    %0 = vector.load %arg3[%c0, %c0_0, %c0_1] : memref<1x16x32xf32, #tpu.memory_space<vmem>>, vector<1x16x32xf32>
    %1 = vector.shape_cast %0 : vector<1x16x32xf32> to vector<16x32xf32>
    %2 = arith.truncf %1 : vector<16x32xf32> to vector<16x32xbf16>
    %c0_2 = arith.constant 0 : index
    %c0_3 = arith.constant 0 : index
    %3 = vector.load %arg4[%c0_2, %c0_3] : memref<32x32xbf16, #tpu.memory_space<vmem>>, vector<32x32xbf16>
    %cst = arith.constant dense<0.000000e+00> : vector<16x32xf32>
    %4 = tpu.matmul %2, %3, %cst {dimension_numbers = #tpu.dot_dimension_numbers<[1], [0], [0], [1], [0, 0, 1, 1], [], []>} : vector<16x32xbf16>, vector<32x32xbf16>, vector<16x32xf32> -> vector<16x32xf32>
    %c0_4 = arith.constant 0 : index
    %c0_5 = arith.constant 0 : index
    %c0_6 = arith.constant 0 : index
    %5 = vector.load %arg2[%c0_4, %c0_5, %c0_6] : memref<1x16x16xf32, #tpu.memory_space<vmem>>, vector<1x16x16xf32>
    %6 = vector.shape_cast %5 : vector<1x16x16xf32> to vector<16x16xf32>
    %7 = arith.truncf %6 : vector<16x16xf32> to vector<16x16xbf16>
    %8 = arith.truncf %4 : vector<16x32xf32> to vector<16x32xbf16>
    %cst_7 = arith.constant dense<0.000000e+00> : vector<16x32xf32>
    %9 = tpu.matmul %7, %8, %cst_7 {dimension_numbers = #tpu.dot_dimension_numbers<[1], [0], [0], [1], [0, 0, 1, 1], [], []>} : vector<16x16xbf16>, vector<16x32xbf16>, vector<16x32xf32> -> vector<16x32xf32>
    %c0_8 = arith.constant 0 : index
    %c0_9 = arith.constant 0 : index
    %10 = vector.load %arg5[%c0_8, %c0_9] : memref<1x32xf32, #tpu.memory_space<vmem>>, vector<1x32xf32>
    %11 = vector.broadcast %10 : vector<1x32xf32> to vector<16x32xf32>
    %12 = arith.addf %9, %11 : vector<16x32xf32>
    %c0_10 = arith.constant 0 : index
    %13 = memref.load %arg1[%c0_10] : memref<1xf32, #tpu.memory_space<smem>>
    %cst_11 = arith.constant 0.000000e+00 : f32
    %14 = vector.broadcast %cst_11 : f32 to vector<16x32xf32>
    %15 = arith.cmpf ogt, %12, %14 : vector<16x32xf32>
    %16 = vector.broadcast %13 : f32 to vector<16x32xf32>
    %17 = arith.mulf %16, %12 : vector<16x32xf32>
    %18 = arith.select %15, %12, %17 : vector<16x32xi1>, vector<16x32xf32>
    %c0_12 = arith.constant 0 : index
    %c0_13 = arith.constant 0 : index
    %c0_14 = arith.constant 0 : index
    %19 = vector.load %arg6[%c0_12, %c0_13, %c0_14] : memref<1x16x32xf32, #tpu.memory_space<vmem>>, vector<1x16x32xf32>
    %20 = vector.shape_cast %19 : vector<1x16x32xf32> to vector<16x32xf32>
    %21 = vector.shape_cast %18 : vector<16x32xf32> to vector<1x16x32xf32>
    tpu.vector_store %arg6[%c0_12, %c0_13, %c0_14], %21 {strides = array<i32>} : memref<1x16x32xf32, #tpu.memory_space<vmem>>, vector<1x16x32xf32>,
    return
  }
  func.func @transform_0(%arg0: i32) -> i32 {
    %c0_i32 = arith.constant 0 : i32
    %c0_i32_0 = arith.constant 0 : i32
    return %c0_i32 : i32
  }
  func.func @transform_1(%arg0: i32) -> (i32, i32, i32) {
    %c0_i32 = arith.constant 0 : i32
    %c0_i32_0 = arith.constant 0 : i32
    %c0_i32_1 = arith.constant 0 : i32
    return %arg0, %c0_i32, %c0_i32_0 : i32, i32, i32
  }
  func.func @transform_2(%arg0: i32) -> (i32, i32, i32) {
    %c0_i32 = arith.constant 0 : i32
    %c0_i32_0 = arith.constant 0 : i32
    %c0_i32_1 = arith.constant 0 : i32
    return %arg0, %c0_i32, %c0_i32_0 : i32, i32, i32
  }
  func.func @transform_3(%arg0: i32) -> (i32, i32) {
    %c0_i32 = arith.constant 0 : i32
    %c0_i32_0 = arith.constant 0 : i32
    %c0_i32_1 = arith.constant 0 : i32
    return %c0_i32, %c0_i32_0 : i32, i32
  }
  func.func @transform_4(%arg0: i32) -> (i32, i32) {
    %c0_i32 = arith.constant 0 : i32
    %c0_i32_0 = arith.constant 0 : i32
    %c0_i32_1 = arith.constant 0 : i32
    return %c0_i32, %c0_i32_0 : i32, i32
  }
  func.func @transform_5(%arg0: i32) -> (i32, i32, i32) {
    %c0_i32 = arith.constant 0 : i32
    %c0_i32_0 = arith.constant 0 : i32
    %c0_i32_1 = arith.constant 0 : i32
    return %arg0, %c0_i32, %c0_i32_0 : i32, i32, i32
  }
}

</mosaic_0001>

<bundles_post_ra>
// kernel: gcnet_forward.1
= control target key start
LH: loop header
LB: loop body
LE: loop exit
PB: predicated region body
PF: predicated region fallthrough
CT: control target
= control target key end

     0   :  { %s913_s0 = inlined_call_operand.<no memory space> [shape: f32[1], index: 0, kind: input, shape index: {}]   ;;  %s914_s1 = inlined_call_operand.vmem [shape: f32[2,16,16], index: 1, kind: input, shape index: {}]   ;;  %s915_s2 = inlined_call_operand.hbm [shape: f32[2,16,32], index: 2, kind: input, shape index: {}]   ;;  %s916_s3 = inlined_call_operand.vmem [shape: bf16[32,32], index: 3, kind: input, shape index: {}]   ;;  %s917_s4 = inlined_call_operand.vmem [shape: f32[1,32], index: 4, kind: input, shape index: {}]   ;;  %s918_s5 = inlined_call_operand.hbm [shape: f32[2,16,32], index: 5, kind: output, shape index: {}]  }
   0x1   :  { %10 = sst [smem:[#allocation2]] %s913_s0 }
   0x2   :  { %11 = vsyncpa [#allocation4], 0 }
   0x3   :  { %13 = vsyncpa [#allocation4 + $0x1], 0 }
   0x4   :  { %14 = vsyncpa [#allocation5], 0 }
   0x5   :  { %16 = vsyncpa [#allocation5 + $0x1], 0  ;;  %s730_s20 = smov 0   ;;  %s732_s21 = smov 0  }
   0x6   :  { %s734_s22 = smov 0   ;;  %s736_s23 = smov 0  }
   0x7 LB: > { %s751_s0 = sadd.s32 4294967295, %s687_s23   ;;  %s494_s24 = sadd.s32 4294967294, %s687_s23   ;;  %s687_s23 = sphi %s736_s23, %s931_s23   ;;  %s683_s22 = sphi %s734_s22, %s930_s22   ;;  %s679_s21 = sphi %s732_s21, %s929_s21   ;;  %s675_s20 = sphi %s730_s20, %s928_s20  }
   0x8   : > { %s755_s25 = sadd.s32 1, %s687_s23   ;;  %s76_s26 = sadd.s32 1, %s683_s22 }
   0x9   : > { %s73_s27 = ssub.s32 %s687_s23, %s755_s25  ;;  %p83_p0 = scmp.ne.s32.totalorder %s683_s22, %s679_s21 }
   0xa   : > { %p74_p1 = scmp.eq.s32.totalorder %s73_s27, 0  ;;  %p84_p2 = scmp.eq.s32.totalorder %s687_s23, 0 }
   0xb   : > { %p89_p3 = scmp.ne.s32.totalorder %s679_s21, %s675_s20  ;;  %p90_p4 = scmp.eq.s32.totalorder %s751_s0, 0 }
   0xc   : > { %s767_s28 = scalar_select %p74_p1, %s683_s22, %s76_s26  }
   0xd   : > { %p769_p5 = por %p84_p2, %p83_p0  ;;  %p773_p6 = por %p90_p4, %p89_p3 }
   0xe   : > { %p155_p7 = scmp.eq.s32.totalorder %s751_s0, 1  ;;  %p161_p8 = scmp.eq.s32.totalorder %s494_s24, 1 }
   0xf   : > { %p549_p10 = scmp.lt.s32.totalorder %s687_s23, 2  ;;  %s198_s8 = sand.u32 1, %s683_s22  }
  0x10   : > { %p780_p11 = por %p155_p7, %p83_p0  ;;  %p784_p12 = por %p161_p8, %p89_p3 }
  0x11   : > { %s515_s9 = sshll.u32 %s687_s23, 8  ;;  %s497_s10 = sshll.u32 %s198_s8, 4 }
  0x12   : > { %s922_s6 = scalar_select %p780_p11, 1, 0 }
  0x13   : > { %s923_s7 = scalar_select %p784_p12, 1, 0 }
  0x14   : > { %s793_s13 = scalar_lea.hbm %s915_s2, %s515_s9  ;;  %s202_s14 = scalar_lea.vmem [#allocation3], %s497_s10 }
  0x15   : > { %s209_s15 = sshll.u32 %s202_s14, 4  ;;  %p797_p13 = pnand %p549_p10, %p769_p5  ;;  %s801_s15 = int_to_ptr.vmem [resolvable:$true] %s209_s15 }
  0x16   : > { %s803_s17 = scalar_lea.sflag [#allocation4], %s198_s8  ;;  %s591_s18 = scalar_lea.hbm %s793_s13, 256 }
  0x17   : > { %p592_p0 = scmp.ne.s32.totalorder %s793_s13, %s591_s18  ;;  %p593_p1 = pneg %p797_p13 }
  0x18   : > { %s596_s26 = scalar_lea.hbm %s915_s2, 512  ;;  %p597_p4 = scmp.lt.u32.totalorder %s793_s13, %s915_s2 }
  0x19   : > { %p594_p2 = pnand %p593_p1, %p592_p0  ;;  %p598_p5 = scmp.lt.u32.totalorder %s596_s26, %s591_s18 }
  0x1a   : > { %p600_p8 = scmp.lt.u32.totalorder %s591_s18, %s793_s13 }
  0x1b   : > { %p595_p3 = pneg %p594_p2  ;;  %p599_p7 = por %p598_p5, %p597_p4 }
  0x1d   : > { %p601_p10 = por %p600_p8, %p599_p7 }
  0x1f   : > { %p602_p9 = pnand %p601_p10, %p595_p3 }
  0x21   : > { %605 = shalt.err (!%p602_p9)
}
  0x22   : > { %s606_s8 = scalar_lea.vmem %s801_s15, 256  ;;  %s689_s9 = smov [#allocation3]  }
  0x23   : > { %p607_p0 = scmp.ne.s32.totalorder %s801_s15, %s606_s8  ;;  %s611_s10 = sshll.u32 %s689_s9, 4  ;;  %s612_s10 = int_to_ptr.vmem [resolvable:$false] %s611_s10 }
  0x24   : > { %s613_s11 = scalar_lea.vmem %s612_s10, 512  ;;  %p614_p11 = scmp.lt.s32.totalorder %s801_s15, %s612_s10 }
  0x25   : > { %p609_p2 = pnand %p607_p0, %p593_p1  ;;  %p615_p4 = scmp.lt.s32.totalorder %s613_s11, %s606_s8 }
  0x27   : > { %p610_p12 = pneg %p609_p2  ;;  %p616_p5 = por %p615_p4, %p614_p11 }
  0x29   : > { %p617_p7 = pnand %p616_p5, %p610_p12 }
  0x2b   : > { %620 = shalt.err (!%p617_p7)
}
  0x2c   : > { %s690_s12 = smov 128   ;;  %s691_s14 = smov 8  }
  0x2d   : > { %544 = dma.hbm_to_vmem [thread:$0]  (!%p797_p13), %s793_s13, 256, %s801_s15, %s803_s17, %s690_s12, %s690_s12, %s691_s14  }
  0x2e   : > { %p500_p9 = scmp.ge.s32.totalorder %s687_s23, 1  ;;  %p217_p1 = scmp.lt.s32.totalorder %s687_s23, 3 }
  0x30   : > { %p218_p3 = pnand %p500_p9, %p217_p1 }
  0x31   : > { %s834_s18 = sand.u32 (!%p218_p3), 1, %s679_s21  }
  0x32   : > { %221 = sbr.rel (%p218_p3) target bundleno = 521 (0x209), region = 40  ;;  %s501_s19 = sshll.u32 (!%p218_p3), %s834_s18, 4 }
  0x33   : > { %s224_s24 = scalar_lea.sflag (!%p218_p3), [#allocation4], %s834_s18  ;;  %s227_s26 = scalar_lea.vmem (!%p218_p3), [#allocation3], %s501_s19 }
  0x39   : > { %666 = dma.done.wait (%p773_p6), %s224_s24, 256  }
  0x3a   : > { %668 = vsyncadd (%p773_p6), %s224_s24, 4294967040  ;;  %v692_v0 = vmov 0.0   ;;  %vm693_vm0 = vmmov 0   ;;  %v589_v1 = vld [vmem:[%s916_s3] sm:$0xff]   ;;  %v590_v2 = vld [vmem:[%s916_s3 + $0x8] sm:$0xff]   ;;  %vm284_vm1 = vcmask 261120  }
  0x3b   : > { %523 = vmatprep.subr.bf16.mxu0 %v692_v0  ;;  %527 = vmatprep.mubr.msk.bf16.mxu0 %vm693_vm0, %v692_v0  ;;  %v265_v3 = vld [vmem:[%s227_s26] sm:$0xff]  ;;  %v266_v4 = vld [vmem:[%s227_s26 + $0x8] sm:$0xff]  ;;  %p259_p6 = scmp.lt.s32.totalorder %s751_s0, 1  ;;  %vm340_vm2 = vcmask 130048   ;;  %s385_s10 = sld [smem:[#allocation2]] }
  0x3c   : > { %531 = vmatprep.subr.bf16.mxu1 %v692_v0  ;;  %533 = vmatprep.mubr.msk.bf16.mxu1 %vm693_vm0, %v692_v0  ;;  %v267_v5 = vpack.c.bf16 %v266_v4, %v265_v3  ;;  %v508_v14 = vld [vmem:[%s917_s4] ss:$0 sm:$0xff]  ;;  %s258_s14 = scalar_lea.vmem [#allocation6], %s501_s19  ;;  %s517_s26 = sshll.u32 %s751_s0, 8 }
  0x3d   : > { %524 = vmatpush3.bf16.msra.mxu0 %v589_v1  ;;  %s260_s30 = scalar_select %p259_p6, %s751_s0, 1 }
  0x3e   : > { %525 = vmatprep.subr.bf16.mxu0 %v692_v0  ;;  %s409_s24 = sshll.u32 %s258_s14, 4  ;;  %s865_s16 = scalar_lea.hbm %s918_s5, %s517_s26  ;;  %s867_s24 = int_to_ptr.vmem [resolvable:$true] %s409_s24 }
  0x3f   : > { %s516_s27 = sshll.u32 %s260_s30, 4  ;;  %s396_s0 = scalar_lea.sflag [#allocation5], %s834_s18 }
  0x40   : > { %s263_s9 = scalar_lea.vmem %s914_s1, %s516_s27  ;;  %s621_s19 = scalar_lea.vmem %s867_s24, 256 }
  0x41   : > { %526 = vmatpush3.bf16.msra.mxu0 %v590_v2  ;;  %v329_v8 = vld [vmem:[%s263_s9] sm:$0xff]  ;;  %v330_v9 = vld [vmem:[%s263_s9 + $0x8] sm:$0xff]  ;;  %v388_v16 = vstv %s385_s10  ;;  %p622_p11 = scmp.ne.s32.totalorder %s867_s24, %s621_s19  ;;  %p925_p12 = scmp.ne.s32.totalorder %s922_s6, 0 }
  0x42   : > { %v331_v13 = vpack.c.bf16 %v330_v9, %v329_v8  ;;  %s694_s17 = smov [#allocation6]  }
  0x43   : > { %p623_p13 = pnand %p622_p11, %p925_p12  ;;  %s625_s30 = sshll.u32 %s694_s17, 4  ;;  %s626_s30 = int_to_ptr.vmem [resolvable:$false] %s625_s30 }
  0x44   : > { %528 = vmatmul.mubr.msk.bf16.vlgmr.msra.gmra.mrb[0].mxu0 %vm284_vm1, %v267_v5  ;;  %s627_s27 = scalar_lea.vmem %s626_s30, 512  ;;  %p628_p10 = scmp.lt.s32.totalorder %s867_s24, %s626_s30 }
  0x45   : > { %p624_p8 = pneg %p623_p13  ;;  %p629_p0 = scmp.lt.s32.totalorder %s627_s27, %s621_s19 }
  0x47   : > { %p630_p2 = por %p629_p0, %p628_p10 }
  0x49   : > { %p631_p4 = pnand %p630_p2, %p624_p8 }
 0x117   : > { %v322_v6 = vpop.f32.mrb[0].mxu0 }
 0x118   : > { %v529_v7 = vpop.f32.mrb[1].mxu0 }
 0x119   : > { %v325_v10 = vpop.f32.mrb[2].mxu0 }
 0x11a   : > { %v332_v11 = vpack.c.bf16 %v325_v10, %v322_v6  ;;  %v530_v12 = vpop.f32.mrb[3].mxu0 }
 0x11c   : > { %532 = vmatpush3.bf16.msra.mxu1 %v332_v11 }
 0x11f   : > { %534 = vmatmul.mubr.msk.bf16.vlgmr.msra.gmra.mrb[0].mxu1 %vm340_vm2, %v331_v13 }
 0x1f2   : > { %v378_v15 = vpop.f32.mrb[0].mxu1 }
 0x1f3   : > { %v379_v17 = vadd.f32 %v508_v14, %v378_v15  ;;  %v535_v18 = vpop.f32.mrb[1].mxu1 }
 0x1f4   : > { %v381_v19 = vpop.f32.mrb[2].mxu1 }
 0x1f5   : > { %vm386_vm3 = vcmp.gt.f32.partialorder %v379_v17, 0.0  ;;  %v389_v20 = vmul.f32 %v388_v16, %v379_v17  ;;  %v382_v21 = vadd.f32 %v508_v14, %v381_v19  ;;  %v536_v22 = vpop.f32.mrb[3].mxu1 }
 0x1f7   : > { %v391_v23 = vsel %vm386_vm3, %v379_v17, %v389_v20  ;;  %vm387_vm4 = vcmp.gt.f32.partialorder %v382_v21, 0.0  ;;  %v390_v24 = vmul.f32 %v388_v16, %v382_v21 }
 0x1f8   : > { %393 = vst.msk [vmem:[%s258_s14] sm:$0xff] %vm284_vm1, %v391_v23 }
 0x1f9   : > { %v392_v25 = vsel %vm387_vm4, %v382_v21, %v390_v24 }
 0x1fa   : > { %394 = vst.msk [vmem:[%s258_s14 + $0x8] sm:$0xff] %vm284_vm1, %v392_v25 }
 0x1fb   : > { %634 = shalt.err (!%p631_p4)
}
 0x1fc   : > { %s635_s29 = scalar_lea.hbm %s865_s16, 256  ;;  %s639_s10 = scalar_lea.hbm %s918_s5, 512 }
 0x1fd   : > { %p636_p5 = scmp.ne.s32.totalorder %s865_s16, %s635_s29  ;;  %p640_p1 = scmp.lt.u32.totalorder %s865_s16, %s918_s5 }
 0x1fe   : > { %p641_p3 = scmp.lt.u32.totalorder %s639_s10, %s635_s29  ;;  %p643_p11 = scmp.lt.u32.totalorder %s635_s29, %s865_s16 }
 0x1ff   : > { %p637_p7 = pnand %p636_p5, %p925_p12 }
 0x200   : > { %p642_p6 = por %p641_p3, %p640_p1 }
 0x201   : > { %p638_p9 = pneg %p637_p7 }
 0x202   : > { %p644_p13 = por %p643_p11, %p642_p6 }
 0x204   : > { %p645_p8 = pnand %p644_p13, %p638_p9 }
 0x206   : > { %648 = shalt.err (!%p645_p8)
}
 0x207   : > { %s695_s14 = smov 128   ;;  %s696_s26 = smov 8  }
 0x208   : > { %539 = dma.vmem_to_hbm [thread:$0]  (%p925_p12), %s867_s24, 256, %s865_s16, %s396_s0, %s695_s14, %s695_s14, %s696_s26  }
 0x209 PF: > { %s424_s13 = sand.u32 1, %s675_s20   ;;  %p926_p10 = scmp.ne.s32.totalorder %s923_s7, 0 }
 0x20a   : > { %p927_p0 = scmp.ge.s32.totalorder %s687_s23, 2  ;;  %s425_s15 = scalar_lea.sflag [#allocation5], %s424_s13 }
 0x20c   : > { %p546_p2 = pnand %p927_p0, %p926_p10 }
 0x20e   : > { %670 = dma.done.wait (!%p546_p2), %s425_s15, 256  }
 0x20f   : > { %672 = vsyncadd (!%p546_p2), %s425_s15, 4294967040  ;;  %p19_p4 = scmp.ge.s32.totalorder %s755_s25, 4   ;;  %s928_s20 = smov %s679_s21 }
 0x210   : > { %s929_s21 = smov %s683_s22  ;;  %s930_s22 = smov %s767_s28 }
 0x211   : > { %s931_s23 = smov %s755_s25  ;;  %21 = sbr.rel (!%p19_p4) target bundleno = 7 (0x7), region = 88 }
 0x218   :  { %430 = vsyncpa [#allocation4], 1 }
 0x219   :  { %432 = vsyncpa [#allocation4 + $0x1], 1 }
 0x21a   :  { %433 = vsyncpa [#allocation5], 1 }
 0x21b   :  { %435 = vsyncpa [#allocation5 + $0x1], 1 }

</bundles_post_ra>
